<compile_context>
chip_gen: v7x
topology: tpu7x:2x2x1
jax: 0.10.0
libtpu: 0.0.40
codegen_flags: <defaults>
</compile_context>

<pallas_src>
import functools

import jax
import jax.numpy as jnp
from jax.experimental import pallas as pl
from jax.experimental.pallas import tpu as pltpu


def cnn_out_size(input_dim, padding, kernel_size, stride):
    return (input_dim + 2 * padding - kernel_size) // stride + 1


def _round_up(a, b):
    return ((a + b - 1) // b) * b


# -----------------------------------------------------------------------------
# Pallas kernel: per batch-slice  O[b] = (relu(X[b] @ W + bias))^T, stored bf16
# -----------------------------------------------------------------------------
def _conv_mm_kernel(x_ref, w_ref, b_ref, o_ref, *, nb):
    # x_ref: (nb, S, Kp) bf16   w_ref: (Kp, Cout) bf16   b_ref: (1, Cout) f32
    # o_ref: (nb, Cout, S) out_dtype
    w = w_ref[...]
    b = b_ref[...]
    for i in range(nb):  # small static unroll (nb <= ~16)
        acc = jnp.dot(x_ref[i], w, preferred_element_type=jnp.float32)  # (S, Cout) f32, MXU
        y = jnp.maximum(acc + b, 0.0)                                   # bias + ReLU in f32
        # In-kernel minor-dim transpose -> output leaves the kernel already channel-major
        # (NCHW); the XLU transpose hides under the HBM-bound DMA stream.
        o_ref[i] = y.T.astype(o_ref.dtype)                              # (Cout, S), bf16 store


def _pick_batch_tile(B, per_batch_block_bytes, *, target_bytes=4 << 20, min_steps=4):
    """Largest divisor of B whose per-step blocks stay under `target_bytes`, while keeping
    >= min_steps grid steps when B allows (>= 2 steps per TensorCore on 2-core v7x; the
    extra split is negligible on 1-core v5e/v6e since steps stay multi-100KB)."""
    nb = 1
    want_steps = min(min_steps, B)
    for d in range(1, B + 1):
        if B % d:
            continue
        if d * per_batch_block_bytes <= target_bytes and B // d >= want_steps:
            nb = d
    return nb


def _fused_conv_matmul(patches, w2d, bias2d, out_dtype):
    """patches:[B,S,Kp] bf16, w2d:[Kp,Cout] bf16, bias2d:[1,Cout] f32
       -> relu(patches @ w2d + bias), transposed per batch: [B, Cout, S] in out_dtype."""
    B, S, Kp = patches.shape
    Cout = w2d.shape[1]

    out_bytes = jnp.dtype(out_dtype).itemsize
    per_batch = S * Kp * 2 + Cout * S * out_bytes
    nb = _pick_batch_tile(B, per_batch)

    return pl.pallas_call(
        functools.partial(_conv_mm_kernel, nb=nb),
        out_shape=jax.ShapeDtypeStruct((B, Cout, S), out_dtype),
        grid=(B // nb,),
        in_specs=[
            pl.BlockSpec((nb, S, Kp), lambda g: (g, 0, 0)),   # streamed patch tiles
            pl.BlockSpec((Kp, Cout), lambda g: (0, 0)),       # resident weight
            pl.BlockSpec((1, Cout), lambda g: (0, 0)),        # resident bias
        ],
        out_specs=pl.BlockSpec((nb, Cout, S), lambda g: (g, 0, 0)),
        compiler_params=pltpu.CompilerParams(
            dimension_semantics=("parallel",),
            # Headroom for larger batch tiles: above v5e's 16 MiB default scoped limit,
            # safely below v7x's 64 MiB physical VMEM.
            vmem_limit_bytes=48 * 1024 * 1024,
            # Best-effort hint: let XLA fuse the im2col producer of operand 0 into the
            # kernel's input pipeline instead of materializing it in HBM.
            allow_input_fusion=[True, False, False],
        ),
    )(patches, w2d, bias2d)


# -----------------------------------------------------------------------------
# im2col: shifted-window concat over the SMALL NHWC input (no transpose of the
# expanded array); feature order (kh, kw, cin); K zero-padded to Kp.
# -----------------------------------------------------------------------------
def _im2col_bf16(x, k, Kp):
    B, C, H, W = x.shape
    OH, OW = H - k + 1, W - k + 1
    xb = x.astype(jnp.bfloat16).transpose(0, 2, 3, 1)      # NHWC; tiny vs. the patch array
    cols = [xb[:, kh:kh + OH, kw:kw + OW, :] for kh in range(k) for kw in range(k)]
    K = C * k * k
    if Kp > K:
        cols.append(jnp.zeros((B, OH, OW, Kp - K), jnp.bfloat16))
    p = jnp.concatenate(cols, axis=-1)                     # (B, OH, OW, Kp)
    return p.reshape(B, OH * OW, Kp), (B, OH, OW)


@functools.partial(jax.jit, static_argnames=("kernel_size", "out_dtype"))
def conv_layer_forward(x, weight, bias, *, kernel_size, out_dtype=jnp.bfloat16):
    """x:[B,Cin,H,W] f32, weight:[Cout,Cin,k,k] f32, bias:[Cout] f32
       -> relu(conv2d(x, weight, bias, stride=1, padding=0)): [B,Cout,OH,OW].

    Precision contract: bf16 multiply, f32 accumulate, `out_dtype` store (default bf16,
    which halves the dominant HBM stream; pass out_dtype=jnp.float32 for PyTorch's dtype).
    """
    Cout, Cin, k, _ = weight.shape
    assert k == kernel_size
    K = Cin * k * k
    Kp = _round_up(K, 128)                                 # lane-dense loads / full MXU feed

    patches, (B, OH, OW) = _im2col_bf16(x, k, Kp)          # (B, S, Kp) bf16
    # Weight rows in the same (kh, kw, cin) order as the patch features.
    w2d = weight.transpose(2, 3, 1, 0).reshape(K, Cout)
    if Kp > K:
        w2d = jnp.pad(w2d, ((0, Kp - K), (0, 0)))          # zero rows: padded K adds 0
    w2d = w2d.astype(jnp.bfloat16)
    bias2d = bias.reshape(1, Cout).astype(jnp.float32)

    out = _fused_conv_matmul(patches, w2d, bias2d, out_dtype)   # (B, Cout, OH*OW)
    # Free minor-dim split (no data movement): kernel already wrote channel-major layout.
    return out.reshape(B, Cout, OH, OW)


if __name__ == "__main__":
    # Small shapes consistent with the module: in_channels=3, out_channels=256,
    # kernel_size=9, stride=1, padding=0; batch=2, spatial 16 -> output 8x8.
    B, Cin, H, W = 2, 3, 16, 16
    Cout, Ksz = 256, 9

    key = jax.random.PRNGKey(0)
    kx, kw_, kb = jax.random.split(key, 3)

    x = jax.random.normal(kx, (B, Cin, H, W), dtype=jnp.float32)

    # Deterministic PyTorch-style Conv2d init: U(-bound, bound), bound = 1/sqrt(fan_in)
    fan_in = Cin * Ksz * Ksz
    bound = 1.0 / (fan_in ** 0.5)
    weight = jax.random.uniform(kw_, (Cout, Cin, Ksz, Ksz), jnp.float32, -bound, bound)
    bias = jax.random.uniform(kb, (Cout,), jnp.float32, -bound, bound)

    out = jax.block_until_ready(conv_layer_forward(x, weight, bias, kernel_size=Ksz))

    OH = cnn_out_size(H, 0, Ksz, 1)
    OW = cnn_out_size(W, 0, Ksz, 1)
    assert out.shape == (B, Cout, OH, OW)
    assert out.dtype == jnp.bfloat16

    # Reference: XLA conv + bias + ReLU on the same bf16-rounded operands (the kernel
    # multiplies in bf16 with f32 accumulation and stores bf16, so the tolerance covers
    # bf16 rounding of the stored result plus accumulation-order differences).
    xr = x.astype(jnp.bfloat16).astype(jnp.float32)
    wr = weight.astype(jnp.bfloat16).astype(jnp.float32)
    ref = jax.lax.conv_general_dilated(
        xr, wr, window_strides=(1, 1), padding="VALID",
        dimension_numbers=("NCHW", "OIHW", "NCHW"),
    ) + bias.reshape(1, Cout, 1, 1)
    ref = jnp.maximum(ref, 0.0)
    out_f32 = out.astype(jnp.float32)
    max_err = float(jnp.max(jnp.abs(out_f32 - ref)))
    assert jnp.allclose(out_f32, ref, atol=3e-2, rtol=3e-2), max_err

    print("KERNEL_OK")
</pallas_src>

<mosaic_0001>
module attributes {stable_mosaic.version = 11 : i64} {
  func.func @_conv_mm_kernel(%arg0: i32, %arg1: memref<1x64x256xbf16, #tpu.memory_space<vmem>>, %arg2: memref<256x256xbf16, #tpu.memory_space<vmem>>, %arg3: memref<1x256xf32, #tpu.memory_space<vmem>>, %arg4: memref<1x256x64xbf16, #tpu.memory_space<vmem>>) attributes {dimension_semantics = [#tpu.dimension_semantics<parallel>], iteration_bounds = array<i64: 2>, scalar_prefetch = 0 : i64, scratch_operands = 0 : i64, tpu.core_type = #tpu.core_type<tc>, window_params = [{transform_indices = @transform_0, window_bounds = array<i64: 1, 64, 256>}, {pipeline_mode = #tpu.pipeline_mode<synchronous>, transform_indices = @transform_1, window_bounds = array<i64: 256, 256>}, {pipeline_mode = #tpu.pipeline_mode<synchronous>, transform_indices = @transform_2, window_bounds = array<i64: 1, 256>}, {transform_indices = @transform_3, window_bounds = array<i64: 1, 256, 64>}]} {
    %c0 = arith.constant 0 : index
    %c0_0 = arith.constant 0 : index
    %0 = vector.load %arg2[%c0, %c0_0] : memref<256x256xbf16, #tpu.memory_space<vmem>>, vector<256x256xbf16>
    %c0_1 = arith.constant 0 : index
    %c0_2 = arith.constant 0 : index
    %1 = vector.load %arg3[%c0_1, %c0_2] : memref<1x256xf32, #tpu.memory_space<vmem>>, vector<1x256xf32>
    %c0_3 = arith.constant 0 : index
    %c0_4 = arith.constant 0 : index
    %c0_5 = arith.constant 0 : index
    %2 = vector.load %arg1[%c0_3, %c0_4, %c0_5] : memref<1x64x256xbf16, #tpu.memory_space<vmem>>, vector<1x64x256xbf16>
    %3 = vector.shape_cast %2 : vector<1x64x256xbf16> to vector<64x256xbf16>
    %cst = arith.constant dense<0.000000e+00> : vector<64x256xf32>
    %4 = tpu.matmul %3, %0, %cst {dimension_numbers = #tpu.dot_dimension_numbers<[1], [0], [0], [1], [0, 0, 1, 1], [], []>} : vector<64x256xbf16>, vector<256x256xbf16>, vector<64x256xf32> -> vector<64x256xf32>
    %5 = vector.broadcast %1 : vector<1x256xf32> to vector<64x256xf32>
    %6 = arith.addf %4, %5 : vector<64x256xf32>
    %cst_6 = arith.constant 0.000000e+00 : f32
    %7 = vector.broadcast %cst_6 : f32 to vector<64x256xf32>
    %8 = arith.maximumf %6, %7 : vector<64x256xf32>
    %9 = tpu.transpose %8, [1, 0] : vector<64x256xf32> -> vector<256x64xf32>
    %10 = arith.truncf %9 : vector<256x64xf32> to vector<256x64xbf16>
    %c0_7 = arith.constant 0 : index
    %c0_8 = arith.constant 0 : index
    %c0_9 = arith.constant 0 : index
    %11 = vector.load %arg4[%c0_7, %c0_8, %c0_9] : memref<1x256x64xbf16, #tpu.memory_space<vmem>>, vector<1x256x64xbf16>
    %12 = vector.shape_cast %11 : vector<1x256x64xbf16> to vector<256x64xbf16>
    %13 = vector.shape_cast %10 : vector<256x64xbf16> to vector<1x256x64xbf16>
    tpu.vector_store %arg4[%c0_7, %c0_8, %c0_9], %13 {strides = array<i32>} : memref<1x256x64xbf16, #tpu.memory_space<vmem>>, vector<1x256x64xbf16>,
    return
  }
  func.func @transform_0(%arg0: i32) -> (i32, i32, i32) {
    %c0_i32 = arith.constant 0 : i32
    %c0_i32_0 = arith.constant 0 : i32
    %c0_i32_1 = arith.constant 0 : i32
    return %arg0, %c0_i32, %c0_i32_0 : i32, i32, i32
  }
  func.func @transform_1(%arg0: i32) -> (i32, i32) {
    %c0_i32 = arith.constant 0 : i32
    %c0_i32_0 = arith.constant 0 : i32
    %c0_i32_1 = arith.constant 0 : i32
    return %c0_i32, %c0_i32_0 : i32, i32
  }
  func.func @transform_2(%arg0: i32) -> (i32, i32) {
    %c0_i32 = arith.constant 0 : i32
    %c0_i32_0 = arith.constant 0 : i32
    %c0_i32_1 = arith.constant 0 : i32
    return %c0_i32, %c0_i32_0 : i32, i32
  }
  func.func @transform_3(%arg0: i32) -> (i32, i32, i32) {
    %c0_i32 = arith.constant 0 : i32
    %c0_i32_0 = arith.constant 0 : i32
    %c0_i32_1 = arith.constant 0 : i32
    return %arg0, %c0_i32, %c0_i32_0 : i32, i32, i32
  }
}

</mosaic_0001>

<bundles_post_ra>
// kernel: conv_layer_forward.2
= control target key start
LH: loop header
LB: loop body
LE: loop exit
PB: predicated region body
PF: predicated region fallthrough
CT: control target
= control target key end

     0   :  { %s1318_s12 = smov 0   ;;  %s1532_s0 = inlined_call_operand.vmem [shape: bf16[256,256], index: 0, kind: input, shape index: {}]   ;;  %s1533_s1 = inlined_call_operand.vmem [shape: f32[1,256], index: 1, kind: input, shape index: {}]   ;;  %s1534_s2 = inlined_call_operand.vmem [shape: bf16[2,8,8,256], index: 2, kind: input, shape index: {}]   ;;  %s1535_s3 = inlined_call_operand.vmem [shape: bf16[2,256,64], index: 3, kind: output, shape index: {}]  }
   0x1 LB: > { %s918_s13 = sadd.s32 4294967295, %s1296_s12   ;;  %p922_p0 = scmp.ge.s32.totalorder %s1296_s12, 1  ;;  %s1296_s12 = sphi %s1318_s12, %s13_s12  }
   0x2   : > { %p137_p1 = scmp.lt.s32.totalorder %s1296_s12, 3 }
   0x4   : > { %p138_p2 = pnand %p922_p0, %p137_p1 }
   0x6   : > { %141 = sbr.rel (%p138_p2) target bundleno = 491 (0x1eb), region = 32 }
   0xd   : > { %v1229_v0 = vld [vmem:[%s1532_s0 + $0x4] ss:$8 sps:$4 sm:$0xff]   ;;  %v1231_v1 = vld [vmem:[%s1532_s0] ss:$8 sps:$4 sm:$0xff]   ;;  %v1232_v2 = vld [vmem:[%s1532_s0 + $0x14] ss:$8 sps:$4 sm:$0xff]   ;;  %v339_v49 = vlaneseq }
   0xe   : > { %549 = vmatprep.subr.bf16.mxu0 %v1229_v0  ;;  %1092 = vmatprep.subr.bf16.mxu1 %v1229_v0  ;;  %v1234_v3 = vld [vmem:[%s1532_s0 + $0x10] ss:$8 sps:$4 sm:$0xff]   ;;  %v1235_v4 = vld [vmem:[%s1532_s0 + $0x24] ss:$8 sps:$4 sm:$0xff]   ;;  %v1237_v5 = vld [vmem:[%s1532_s0 + $0x20] ss:$8 sps:$4 sm:$0xff]  }
   0xf   : > { %550 = vmatpush1.bf16.msra.mxu0 %v1231_v1  ;;  %1108 = vmatpush1.bf16.msra.mxu1 %v1231_v1  ;;  %p161_p3 = scmp.lt.s32.totalorder %s918_s13, 1  ;;  %v1238_v6 = vld [vmem:[%s1532_s0 + $0x34] ss:$8 sps:$4 sm:$0xff]   ;;  %v1240_v7 = vld [vmem:[%s1532_s0 + $0x30] ss:$8 sps:$4 sm:$0xff]   ;;  %v340_v50 = vshrl.u32 %v339_v49, 7 }
  0x10   : > { %551 = vmatprep.subr.bf16.mxu0 %v1232_v2  ;;  %1093 = vmatprep.subr.bf16.mxu1 %v1232_v2  ;;  %v1241_v8 = vld [vmem:[%s1532_s0 + $0x44] ss:$8 sps:$4 sm:$0xff]   ;;  %v1243_v9 = vld [vmem:[%s1532_s0 + $0x40] ss:$8 sps:$4 sm:$0xff]   ;;  %v1244_v10 = vld [vmem:[%s1532_s0 + $0x54] ss:$8 sps:$4 sm:$0xff]  }
  0x11   : > { %s1537_s13 = smov (!%p161_p3, %s918_s13), 1  ;;  %v1246_v11 = vld [vmem:[%s1532_s0 + $0x50] ss:$8 sps:$4 sm:$0xff]   ;;  %v1247_v12 = vld [vmem:[%s1532_s0 + $0x64] ss:$8 sps:$4 sm:$0xff]   ;;  %v341_v51 = vsub.s32 0, %v340_v50 }
  0x12   : > { %s1016_s7 = sshll.u32 %s1537_s13, 6  ;;  %v1249_v13 = vld [vmem:[%s1532_s0 + $0x60] ss:$8 sps:$4 sm:$0xff]   ;;  %v1250_v15 = vld [vmem:[%s1532_s0 + $0x74] ss:$8 sps:$4 sm:$0xff]   ;;  %v345_v53 = vsub.s32 1, %v340_v50 }
  0x13   : > { %552 = vmatpush1.bf16.msra.mxu0 %v1234_v3  ;;  %1109 = vmatpush1.bf16.msra.mxu1 %v1234_v3  ;;  %s165_s14 = scalar_lea.vmem %s1534_s2, %s1016_s7  ;;  %v1252_v19 = vld [vmem:[%s1532_s0 + $0x70] ss:$8 sps:$4 sm:$0xff]   ;;  %v1253_v23 = vld [vmem:[%s1532_s0 + $0x84] ss:$8 sps:$4 sm:$0xff]   ;;  %v1255_v28 = vld [vmem:[%s1532_s0 + $0x80] ss:$8 sps:$4 sm:$0xff]  }
  0x14   : > { %553 = vmatprep.subr.bf16.mxu0 %v1235_v4  ;;  %1094 = vmatprep.subr.bf16.mxu1 %v1235_v4  ;;  %v171_v14 = vld [vmem:[%s165_s14] sm:$0xff]   ;;  %v1377_v16 = vld [vmem:[%s165_s14 + $0x8] sm:$0xff]   ;;  %v1379_v17 = vld [vmem:[%s165_s14 + $0x10] sm:$0xff]   ;;  %s1017_s7 = sshll.u32 %s1537_s13, 7  ;;  %vm830_vm0 = vcmask 519168  }
  0x15   : > { %176 = vst [vmem:[#allocation2] sm:$0xff] %v171_v14   ;;  %v1381_v18 = vld [vmem:[%s165_s14 + $0x18] sm:$0xff]   ;;  %v1386_v20 = vld [vmem:[%s165_s14 + $0x20] sm:$0xff]   ;;  %v1388_v21 = vld [vmem:[%s165_s14 + $0x28] sm:$0xff]   ;;  %s1463_s10 = scalar_lea.vmem %s1535_s3, %s1017_s7 }
  0x16   : > { %v1390_v22 = vld [vmem:[%s165_s14 + $0x30] sm:$0xff]   ;;  %v947_v24 = vcombine.high %v1386_v20, %v1388_v21  ;;  %v1397_v25 = vld [vmem:[%s165_s14 + $0x38] sm:$0xff]   ;;  %v1259_v31 = vld [vmem:[%s1532_s0 + $0xa4] ss:$8 sps:$4 sm:$0xff]   ;;  %v946_v44 = vcombine.low %v1386_v20, %v1388_v21  ;;  %v945_v45 = vcombine.high %v1379_v17, %v1381_v18  ;;  %v944_v47 = vcombine.low %v1379_v17, %v1381_v18 }
  0x17   : > { %554 = vmatpush1.bf16.msra.mxu0 %v1237_v5  ;;  %1110 = vmatpush1.bf16.msra.mxu1 %v1237_v5  ;;  %v1256_v29 = vld [vmem:[%s1532_s0 + $0x94] ss:$8 sps:$4 sm:$0xff]   ;;  %v1258_v30 = vld [vmem:[%s1532_s0 + $0x90] ss:$8 sps:$4 sm:$0xff]   ;;  %v1261_v32 = vld [vmem:[%s1532_s0 + $0xa0] ss:$8 sps:$4 sm:$0xff]   ;;  %v949_v46 = vcombine.high %v1390_v22, %v1397_v25  ;;  %v948_v48 = vcombine.low %v1390_v22, %v1397_v25 }
  0x18   : > { %555 = vmatprep.subr.bf16.mxu0 %v1238_v6  ;;  %1095 = vmatprep.subr.bf16.mxu1 %v1238_v6  ;;  %v1262_v33 = vld [vmem:[%s1532_s0 + $0xb4] ss:$8 sps:$4 sm:$0xff]   ;;  %v1264_v34 = vld [vmem:[%s1532_s0 + $0xb0] ss:$8 sps:$4 sm:$0xff]   ;;  %v1265_v35 = vld [vmem:[%s1532_s0 + $0xc4] ss:$8 sps:$4 sm:$0xff]  }
  0x19   : > { %601 = vmatprep.mubr.bf16.mxu1 %v947_v24  ;;  %v1267_v36 = vld [vmem:[%s1532_s0 + $0xc0] ss:$8 sps:$4 sm:$0xff]   ;;  %v1268_v37 = vld [vmem:[%s1532_s0 + $0xd4] ss:$8 sps:$4 sm:$0xff]   ;;  %v1270_v38 = vld [vmem:[%s1532_s0 + $0xd0] ss:$8 sps:$4 sm:$0xff]  }
  0x1a   : > { %v1271_v39 = vld [vmem:[%s1532_s0 + $0xe4] ss:$8 sps:$4 sm:$0xff]   ;;  %v1273_v40 = vld [vmem:[%s1532_s0 + $0xe0] ss:$8 sps:$4 sm:$0xff]   ;;  %v1274_v41 = vld [vmem:[%s1532_s0 + $0xf4] ss:$8 sps:$4 sm:$0xff]  }
  0x1b   : > { %556 = vmatpush1.bf16.msra.mxu0 %v1240_v7  ;;  %1111 = vmatpush1.bf16.msra.mxu1 %v1240_v7  ;;  %v1276_v42 = vld [vmem:[%s1532_s0 + $0xf0] ss:$8 sps:$4 sm:$0xff]   ;;  %v329_v52 = vld [vmem:[%s1533_s1] sm:$0x3] }
  0x1c   : > { %557 = vmatprep.subr.bf16.mxu0 %v1241_v8  ;;  %1096 = vmatprep.subr.bf16.mxu1 %v1241_v8  ;;  %v330_v26 = vld [vmem:[#allocation2] sm:$0xff]  ;;  %v342_v54 = vrot.slane %v329_v52, %v341_v51  ;;  %v346_v55 = vrot.slane %v329_v52, %v345_v53 }
  0x1d   : > { %v943_v27 = vcombine.high %v330_v26, %v1377_v16  ;;  %v942_v43 = vcombine.low %v330_v26, %v1377_v16 }
  0x1f   : > { %558 = vmatpush1.bf16.msra.mxu0 %v1243_v9  ;;  %1112 = vmatpush1.bf16.msra.mxu1 %v1243_v9 }
  0x20   : > { %559 = vmatprep.subr.bf16.mxu0 %v1244_v10  ;;  %1097 = vmatprep.subr.bf16.mxu1 %v1244_v10 }
  0x21   : > { %581 = vmatprep.mubr.bf16.mxu0 %v943_v27 }
  0x23   : > { %560 = vmatpush1.bf16.msra.mxu0 %v1246_v11  ;;  %1113 = vmatpush1.bf16.msra.mxu1 %v1246_v11 }
  0x24   : > { %561 = vmatprep.subr.bf16.mxu0 %v1247_v12  ;;  %1098 = vmatprep.subr.bf16.mxu1 %v1247_v12 }
  0x27   : > { %562 = vmatpush1.bf16.msra.mxu0 %v1249_v13  ;;  %1114 = vmatpush1.bf16.msra.mxu1 %v1249_v13 }
  0x28   : > { %563 = vmatprep.subr.bf16.mxu0 %v1250_v15  ;;  %1099 = vmatprep.subr.bf16.mxu1 %v1250_v15 }
  0x2b   : > { %564 = vmatpush1.bf16.msra.mxu0 %v1252_v19  ;;  %1115 = vmatpush1.bf16.msra.mxu1 %v1252_v19 }
  0x2c   : > { %565 = vmatprep.subr.bf16.mxu0 %v1253_v23  ;;  %1100 = vmatprep.subr.bf16.mxu1 %v1253_v23 }
  0x2f   : > { %566 = vmatpush1.bf16.msra.mxu0 %v1255_v28  ;;  %1116 = vmatpush1.bf16.msra.mxu1 %v1255_v28 }
  0x30   : > { %567 = vmatprep.subr.bf16.mxu0 %v1256_v29  ;;  %1101 = vmatprep.subr.bf16.mxu1 %v1256_v29 }
  0x33   : > { %568 = vmatpush1.bf16.msra.mxu0 %v1258_v30  ;;  %1117 = vmatpush1.bf16.msra.mxu1 %v1258_v30 }
  0x34   : > { %569 = vmatprep.subr.bf16.mxu0 %v1259_v31  ;;  %1102 = vmatprep.subr.bf16.mxu1 %v1259_v31 }
  0x37   : > { %570 = vmatpush1.bf16.msra.mxu0 %v1261_v32  ;;  %1118 = vmatpush1.bf16.msra.mxu1 %v1261_v32 }
  0x38   : > { %571 = vmatprep.subr.bf16.mxu0 %v1262_v33  ;;  %1103 = vmatprep.subr.bf16.mxu1 %v1262_v33 }
  0x3b   : > { %572 = vmatpush1.bf16.msra.mxu0 %v1264_v34  ;;  %1119 = vmatpush1.bf16.msra.mxu1 %v1264_v34 }
  0x3c   : > { %573 = vmatprep.subr.bf16.mxu0 %v1265_v35  ;;  %1104 = vmatprep.subr.bf16.mxu1 %v1265_v35 }
  0x3f   : > { %574 = vmatpush1.bf16.msra.mxu0 %v1267_v36  ;;  %1120 = vmatpush1.bf16.msra.mxu1 %v1267_v36 }
  0x40   : > { %575 = vmatprep.subr.bf16.mxu0 %v1268_v37  ;;  %1105 = vmatprep.subr.bf16.mxu1 %v1268_v37 }
  0x43   : > { %576 = vmatpush1.bf16.msra.mxu0 %v1270_v38  ;;  %1121 = vmatpush1.bf16.msra.mxu1 %v1270_v38 }
  0x44   : > { %577 = vmatprep.subr.bf16.mxu0 %v1271_v39  ;;  %1106 = vmatprep.subr.bf16.mxu1 %v1271_v39 }
  0x47   : > { %578 = vmatpush1.bf16.msra.mxu0 %v1273_v40  ;;  %1122 = vmatpush1.bf16.msra.mxu1 %v1273_v40 }
  0x48   : > { %579 = vmatprep.subr.bf16.mxu0 %v1274_v41  ;;  %1107 = vmatprep.subr.bf16.mxu1 %v1274_v41 }
  0x4b   : > { %580 = vmatpush1.bf16.msra.mxu0 %v1276_v42  ;;  %1123 = vmatpush1.bf16.msra.mxu1 %v1276_v42 }
  0x4e   : > { %582 = vmatmul.mubr.bf16.vlgmr.msra.gmra.mrb[0].mxu0 %v942_v43  ;;  %602 = vmatmul.mubr.bf16.vlgmr.msra.gmra.mrb[0].mxu1 %v946_v44 }
  0x4f   : > { %591 = vmatprep.mubr.bf16.mxu0 %v945_v45  ;;  %611 = vmatprep.mubr.bf16.mxu1 %v949_v46 }
  0x56   : > { %592 = vmatmul.mubr.bf16.gmra.mrb[4].mxu0 %v944_v47  ;;  %612 = vmatmul.mubr.bf16.gmra.mrb[4].mxu1 %v948_v48 }
 0x121   : > { %v583_v56 = vpop.f32.mrb[0].mxu0  ;;  %v603_v57 = vpop.f32.mrb[0].mxu1 }
 0x122   : > { %v584_v58 = vadd.f32 %v583_v56, %v342_v54  ;;  %v585_v59 = vpop.f32.mrb[1].mxu0  ;;  %v604_v60 = vadd.f32 %v603_v57, %v342_v54  ;;  %v605_v61 = vpop.f32.mrb[1].mxu1 }
 0x123   : > { %v586_v62 = vadd.f32 %v585_v59, %v346_v55  ;;  %v587_v63 = vpop.f32.mrb[2].mxu0  ;;  %v606_v0 = vadd.f32 %v605_v61, %v346_v55  ;;  %v607_v1 = vpop.f32.mrb[2].mxu1 }
 0x124   : > { %v622_v2 = vmax.f32 %v584_v58, 0.0  ;;  %v588_v3 = vadd.f32 %v587_v63, %v342_v54  ;;  %v589_v4 = vpop.f32.mrb[3].mxu0  ;;  %v630_v5 = vmax.f32 %v604_v60, 0.0  ;;  %v608_v6 = vadd.f32 %v607_v1, %v342_v54  ;;  %v609_v7 = vpop.f32.mrb[3].mxu1 }
 0x125   : > { %v623_v8 = vmax.f32 %v586_v62, 0.0  ;;  %v590_v9 = vadd.f32 %v589_v4, %v346_v55  ;;  %v631_v10 = vmax.f32 %v606_v0, 0.0  ;;  %v610_v11 = vadd.f32 %v609_v7, %v346_v55 }
 0x126   : > { %v624_v12 = vmax.f32 %v588_v3, 0.0  ;;  %v632_v13 = vmax.f32 %v608_v6, 0.0 }
 0x127   : > { %v625_v14 = vmax.f32 %v590_v9, 0.0  ;;  %v1133_v15 = vpack.i.bf16 %v623_v8, %v622_v2  ;;  %v633_v16 = vmax.f32 %v610_v11, 0.0  ;;  %v1141_v17 = vpack.i.bf16 %v631_v10, %v630_v5 }
 0x129   : > { %v593_v18 = vpop.f32.mrb[4].mxu0  ;;  %1134 = vxpose.xlu0.b32.start [1/8] (short) %v1133_v15, 128  ;;  %v1135_v19 = vpack.i.bf16 %v625_v14, %v624_v12  ;;  %v613_v20 = vpop.f32.mrb[4].mxu1  ;;  %v1143_v21 = vpack.i.bf16 %v633_v16, %v632_v13 }
 0x12a   : > { %v594_v22 = vadd.f32 %v593_v18, %v342_v54  ;;  %v595_v23 = vpop.f32.mrb[5].mxu0  ;;  %v614_v24 = vadd.f32 %v613_v20, %v342_v54  ;;  %v615_v25 = vpop.f32.mrb[5].mxu1 }
 0x12b   : > { %v596_v26 = vadd.f32 %v595_v23, %v346_v55  ;;  %v597_v27 = vpop.f32.mrb[6].mxu0  ;;  %v616_v28 = vadd.f32 %v615_v25, %v346_v55  ;;  %v617_v29 = vpop.f32.mrb[6].mxu1 }
 0x12c   : > { %v626_v30 = vmax.f32 %v594_v22, 0.0  ;;  %v598_v31 = vadd.f32 %v597_v27, %v342_v54  ;;  %v599_v32 = vpop.f32.mrb[7].mxu0  ;;  %v634_v33 = vmax.f32 %v614_v24, 0.0  ;;  %v618_v34 = vadd.f32 %v617_v29, %v342_v54  ;;  %v619_v35 = vpop.f32.mrb[7].mxu1 }
 0x12d   : > { %v627_v36 = vmax.f32 %v596_v26, 0.0  ;;  %v600_v37 = vadd.f32 %v599_v32, %v346_v55  ;;  %1136 = vxpose.xlu0.b32.cont [2/8] (short) %v1135_v19, 128  ;;  %v635_v38 = vmax.f32 %v616_v28, 0.0  ;;  %v620_v39 = vadd.f32 %v619_v35, %v346_v55 }
 0x12e   : > { %v628_v40 = vmax.f32 %v598_v31, 0.0  ;;  %v636_v41 = vmax.f32 %v618_v34, 0.0 }
 0x12f   : > { %v629_v42 = vmax.f32 %v600_v37, 0.0  ;;  %v1137_v43 = vpack.i.bf16 %v627_v36, %v626_v30  ;;  %v637_v44 = vmax.f32 %v620_v39, 0.0  ;;  %v1145_v45 = vpack.i.bf16 %v635_v38, %v634_v33 }
 0x131   : > { %1138 = vxpose.xlu0.b32.cont [3/8] (short) %v1137_v43, 128  ;;  %v1139_v46 = vpack.i.bf16 %v629_v42, %v628_v40  ;;  %v1147_v47 = vpack.i.bf16 %v637_v44, %v636_v41 }
 0x135   : > { %1140 = vxpose.xlu0.b32.cont [4/8] (short) %v1139_v46, 128 }
 0x139   : > { %1142 = vxpose.xlu0.b32.cont [5/8] (short) %v1141_v17, 128 }
 0x13d   : > { %1144 = vxpose.xlu0.b32.cont [6/8] (short) %v1143_v21, 128 }
 0x141   : > { %1146 = vxpose.xlu0.b32.cont [7/8] (short) %v1145_v45, 128 }
 0x145   : > { %1148 = vxpose.xlu0.b32.end [8/8] (short) %v1147_v47, 128 }
 0x1a9   : > { %v1149_v48 = vpop.trf.xlu0 }
 0x1aa   : > { %v1153_v49 = vunpack.i.h.bf16 %v1149_v48  ;;  %v1150_v50 = vunpack.i.l.bf16 %v1149_v48 }
 0x1ac   : > { %v1034_v51 = vpack.c.bf16 %v1153_v49, %v1153_v49  ;;  %v1018_v52 = vpack.c.bf16 %v1150_v50, %v1150_v50 }
 0x1ad   : > { %v1154_v53 = vpop.trf.xlu0 }
 0x1ae   : > { %847 = vst.msk [vmem:[%s1463_s10 + $0x40] sm:$0xf] %vm830_vm0, %v1034_v51  ;;  %831 = vst.msk [vmem:[%s1463_s10] sm:$0xf] %vm830_vm0, %v1018_v52  ;;  %v1158_v54 = vunpack.i.h.bf16 %v1154_v53  ;;  %v1155_v55 = vunpack.i.l.bf16 %v1154_v53 }
 0x1b0   : > { %v1035_v56 = vpack.c.bf16 %v1158_v54, %v1158_v54  ;;  %v1019_v57 = vpack.c.bf16 %v1155_v55, %v1155_v55 }
 0x1b1   : > { %v1159_v58 = vpop.trf.xlu0 }
 0x1b2   : > { %848 = vst.msk [vmem:[%s1463_s10 + $0x44] sm:$0xf] %vm830_vm0, %v1035_v56  ;;  %832 = vst.msk [vmem:[%s1463_s10 + $0x4] sm:$0xf] %vm830_vm0, %v1019_v57  ;;  %v1163_v59 = vunpack.i.h.bf16 %v1159_v58  ;;  %v1160_v60 = vunpack.i.l.bf16 %v1159_v58 }
 0x1b4   : > { %v1036_v61 = vpack.c.bf16 %v1163_v59, %v1163_v59  ;;  %v1020_v62 = vpack.c.bf16 %v1160_v60, %v1160_v60 }
 0x1b5   : > { %v1164_v63 = vpop.trf.xlu0 }
 0x1b6   : > { %849 = vst.msk [vmem:[%s1463_s10 + $0x48] sm:$0xf] %vm830_vm0, %v1036_v61  ;;  %833 = vst.msk [vmem:[%s1463_s10 + $0x8] sm:$0xf] %vm830_vm0, %v1020_v62  ;;  %v1168_v0 = vunpack.i.h.bf16 %v1164_v63  ;;  %v1165_v1 = vunpack.i.l.bf16 %v1164_v63 }
 0x1b8   : > { %v1037_v2 = vpack.c.bf16 %v1168_v0, %v1168_v0  ;;  %v1021_v3 = vpack.c.bf16 %v1165_v1, %v1165_v1 }
 0x1b9   : > { %v1169_v4 = vpop.trf.xlu0 }
 0x1ba   : > { %850 = vst.msk [vmem:[%s1463_s10 + $0x4c] sm:$0xf] %vm830_vm0, %v1037_v2  ;;  %834 = vst.msk [vmem:[%s1463_s10 + $0xc] sm:$0xf] %vm830_vm0, %v1021_v3  ;;  %v1173_v5 = vunpack.i.h.bf16 %v1169_v4  ;;  %v1170_v6 = vunpack.i.l.bf16 %v1169_v4 }
 0x1bc   : > { %v1038_v7 = vpack.c.bf16 %v1173_v5, %v1173_v5  ;;  %v1022_v8 = vpack.c.bf16 %v1170_v6, %v1170_v6 }
 0x1bd   : > { %v1174_v9 = vpop.trf.xlu0 }
 0x1be   : > { %851 = vst.msk [vmem:[%s1463_s10 + $0x50] sm:$0xf] %vm830_vm0, %v1038_v7  ;;  %835 = vst.msk [vmem:[%s1463_s10 + $0x10] sm:$0xf] %vm830_vm0, %v1022_v8  ;;  %v1178_v10 = vunpack.i.h.bf16 %v1174_v9  ;;  %v1175_v11 = vunpack.i.l.bf16 %v1174_v9 }
 0x1c0   : > { %v1039_v12 = vpack.c.bf16 %v1178_v10, %v1178_v10  ;;  %v1023_v13 = vpack.c.bf16 %v1175_v11, %v1175_v11 }
 0x1c1   : > { %v1179_v14 = vpop.trf.xlu0 }
 0x1c2   : > { %852 = vst.msk [vmem:[%s1463_s10 + $0x54] sm:$0xf] %vm830_vm0, %v1039_v12  ;;  %836 = vst.msk [vmem:[%s1463_s10 + $0x14] sm:$0xf] %vm830_vm0, %v1023_v13  ;;  %v1183_v15 = vunpack.i.h.bf16 %v1179_v14  ;;  %v1180_v16 = vunpack.i.l.bf16 %v1179_v14 }
 0x1c4   : > { %v1040_v17 = vpack.c.bf16 %v1183_v15, %v1183_v15  ;;  %v1024_v18 = vpack.c.bf16 %v1180_v16, %v1180_v16 }
 0x1c5   : > { %v1184_v19 = vpop.trf.xlu0 }
 0x1c6   : > { %853 = vst.msk [vmem:[%s1463_s10 + $0x58] sm:$0xf] %vm830_vm0, %v1040_v17  ;;  %837 = vst.msk [vmem:[%s1463_s10 + $0x18] sm:$0xf] %vm830_vm0, %v1024_v18  ;;  %v1188_v20 = vunpack.i.h.bf16 %v1184_v19  ;;  %v1185_v21 = vunpack.i.l.bf16 %v1184_v19 }
 0x1c8   : > { %v1041_v22 = vpack.c.bf16 %v1188_v20, %v1188_v20  ;;  %v1025_v23 = vpack.c.bf16 %v1185_v21, %v1185_v21 }
 0x1c9   : > { %v1189_v24 = vpop.trf.xlu0 }
 0x1ca   : > { %854 = vst.msk [vmem:[%s1463_s10 + $0x5c] sm:$0xf] %vm830_vm0, %v1041_v22  ;;  %838 = vst.msk [vmem:[%s1463_s10 + $0x1c] sm:$0xf] %vm830_vm0, %v1025_v23  ;;  %v1193_v25 = vunpack.i.h.bf16 %v1189_v24  ;;  %v1190_v26 = vunpack.i.l.bf16 %v1189_v24 }
 0x1cc   : > { %v1042_v27 = vpack.c.bf16 %v1193_v25, %v1193_v25  ;;  %v1026_v28 = vpack.c.bf16 %v1190_v26, %v1190_v26 }
 0x1cd   : > { %v1194_v29 = vpop.trf.xlu0 }
 0x1ce   : > { %855 = vst.msk [vmem:[%s1463_s10 + $0x60] sm:$0xf] %vm830_vm0, %v1042_v27  ;;  %839 = vst.msk [vmem:[%s1463_s10 + $0x20] sm:$0xf] %vm830_vm0, %v1026_v28  ;;  %v1198_v30 = vunpack.i.h.bf16 %v1194_v29  ;;  %v1195_v31 = vunpack.i.l.bf16 %v1194_v29 }
 0x1d0   : > { %v1043_v32 = vpack.c.bf16 %v1198_v30, %v1198_v30  ;;  %v1027_v33 = vpack.c.bf16 %v1195_v31, %v1195_v31 }
 0x1d1   : > { %v1199_v34 = vpop.trf.xlu0 }
 0x1d2   : > { %856 = vst.msk [vmem:[%s1463_s10 + $0x64] sm:$0xf] %vm830_vm0, %v1043_v32  ;;  %840 = vst.msk [vmem:[%s1463_s10 + $0x24] sm:$0xf] %vm830_vm0, %v1027_v33  ;;  %v1203_v35 = vunpack.i.h.bf16 %v1199_v34  ;;  %v1200_v36 = vunpack.i.l.bf16 %v1199_v34 }
 0x1d4   : > { %v1044_v37 = vpack.c.bf16 %v1203_v35, %v1203_v35  ;;  %v1028_v38 = vpack.c.bf16 %v1200_v36, %v1200_v36 }
 0x1d5   : > { %v1204_v39 = vpop.trf.xlu0 }
 0x1d6   : > { %857 = vst.msk [vmem:[%s1463_s10 + $0x68] sm:$0xf] %vm830_vm0, %v1044_v37  ;;  %841 = vst.msk [vmem:[%s1463_s10 + $0x28] sm:$0xf] %vm830_vm0, %v1028_v38  ;;  %v1208_v40 = vunpack.i.h.bf16 %v1204_v39  ;;  %v1205_v41 = vunpack.i.l.bf16 %v1204_v39 }
 0x1d8   : > { %v1045_v42 = vpack.c.bf16 %v1208_v40, %v1208_v40  ;;  %v1029_v43 = vpack.c.bf16 %v1205_v41, %v1205_v41 }
 0x1d9   : > { %v1209_v44 = vpop.trf.xlu0 }
 0x1da   : > { %858 = vst.msk [vmem:[%s1463_s10 + $0x6c] sm:$0xf] %vm830_vm0, %v1045_v42  ;;  %842 = vst.msk [vmem:[%s1463_s10 + $0x2c] sm:$0xf] %vm830_vm0, %v1029_v43  ;;  %v1213_v45 = vunpack.i.h.bf16 %v1209_v44  ;;  %v1210_v46 = vunpack.i.l.bf16 %v1209_v44 }
 0x1dc   : > { %v1046_v47 = vpack.c.bf16 %v1213_v45, %v1213_v45  ;;  %v1030_v48 = vpack.c.bf16 %v1210_v46, %v1210_v46 }
 0x1dd   : > { %v1214_v49 = vpop.trf.xlu0 }
 0x1de   : > { %859 = vst.msk [vmem:[%s1463_s10 + $0x70] sm:$0xf] %vm830_vm0, %v1046_v47  ;;  %843 = vst.msk [vmem:[%s1463_s10 + $0x30] sm:$0xf] %vm830_vm0, %v1030_v48  ;;  %v1218_v50 = vunpack.i.h.bf16 %v1214_v49  ;;  %v1215_v51 = vunpack.i.l.bf16 %v1214_v49 }
 0x1e0   : > { %v1047_v52 = vpack.c.bf16 %v1218_v50, %v1218_v50  ;;  %v1031_v53 = vpack.c.bf16 %v1215_v51, %v1215_v51 }
 0x1e1   : > { %v1219_v54 = vpop.trf.xlu0 }
 0x1e2   : > { %860 = vst.msk [vmem:[%s1463_s10 + $0x74] sm:$0xf] %vm830_vm0, %v1047_v52  ;;  %844 = vst.msk [vmem:[%s1463_s10 + $0x34] sm:$0xf] %vm830_vm0, %v1031_v53  ;;  %v1223_v55 = vunpack.i.h.bf16 %v1219_v54  ;;  %v1220_v56 = vunpack.i.l.bf16 %v1219_v54 }
 0x1e4   : > { %v1048_v57 = vpack.c.bf16 %v1223_v55, %v1223_v55  ;;  %v1032_v58 = vpack.c.bf16 %v1220_v56, %v1220_v56 }
 0x1e5   : > { %v1224_v59 = vpop.trf.xlu0 }
 0x1e6   : > { %861 = vst.msk [vmem:[%s1463_s10 + $0x78] sm:$0xf] %vm830_vm0, %v1048_v57  ;;  %845 = vst.msk [vmem:[%s1463_s10 + $0x38] sm:$0xf] %vm830_vm0, %v1032_v58  ;;  %v1228_v60 = vunpack.i.h.bf16 %v1224_v59  ;;  %v1225_v61 = vunpack.i.l.bf16 %v1224_v59 }
 0x1e8   : > { %v1049_v62 = vpack.c.bf16 %v1228_v60, %v1228_v60  ;;  %v1033_v63 = vpack.c.bf16 %v1225_v61, %v1225_v61 }
 0x1ea   : > { %862 = vst.msk [vmem:[%s1463_s10 + $0x7c] sm:$0xf] %vm830_vm0, %v1049_v62  ;;  %846 = vst.msk [vmem:[%s1463_s10 + $0x3c] sm:$0xf] %vm830_vm0, %v1033_v63 }
 0x1eb PF: > { %s13_s12 = sadd.s32 1, %s1296_s12  }
 0x1ec   : > { %p10_p4 = scmp.ge.s32.totalorder %s13_s12, 4  }
 0x1ee   :  { %12 = sbr.rel (!%p10_p4) target bundleno = 1 (0x1), region = 92 }

</bundles_post_ra>
